<compile_context>
chip_gen: v7x
topology: tpu7x:2x2x1
jax: 0.10.0
libtpu: 0.0.40
codegen_flags: <defaults>
</compile_context>

<pallas_src>
import functools

import jax
import jax.numpy as jnp
from jax.experimental import pallas as pl
from jax.experimental.pallas import tpu as pltpu


# ----------------------------------------------------------------------------
# Pallas kernel: whole AttentionGate hot path for one (batch, spatial) tile.
# ----------------------------------------------------------------------------
def _attention_gate_kernel(g_ref, s_ref, wg_ref, ws_ref, bgs_ref, wo_ref,
                           bo_ref, o_ref):
    g = g_ref[0]                      # (Cg, THW)  spatial in lanes
    s = s_ref[0]                      # (Cs, THW)
    # 1x1 convs (+ folded BN) as weight-stationary matmuls, f32 accumulation.
    a = jnp.dot(wg_ref[...], g, preferred_element_type=jnp.float32)
    b = jnp.dot(ws_ref[...], s, preferred_element_type=jnp.float32)
    # ReLU(Wg(g) + Ws(s)); the two BN biases are pre-folded into one (f32 VPU).
    h = jnp.maximum(a + b + bgs_ref[...], 0.0)
    # output 1x1 conv + sigmoid -> attention coefficients.
    logits = jnp.dot(wo_ref[...], h.astype(wo_ref.dtype),
                     preferred_element_type=jnp.float32) + bo_ref[...]
    att = jax.nn.sigmoid(logits)
    # gate the skip connection (Cs == Co, enforced in the wrapper).
    o_ref[0] = (att * s.astype(jnp.float32)).astype(o_ref.dtype)


def _pick_hw_tile(hw, per_column_bytes, target_bytes=4 << 20):
    """Largest lane tile that is a multiple of 128, divides hw, and keeps the
    double-buffered streaming working set under target_bytes.  Falls back to
    the full (un-tiled) spatial extent when hw is not a multiple of 128."""
    if hw % 128 != 0:
        return hw
    n128 = hw // 128
    for d in range(n128, 0, -1):
        if n128 % d == 0 and 128 * d * per_column_bytes <= target_bytes:
            return 128 * d
    return 128


def attention_gate_pallas(g_ncm, s_ncm, wg, ws, b_gs, wo, bo, *,
                          out_dtype=None, hw_tile=None):
    """g_ncm: (N, Cg, HW), s_ncm: (N, Cs, HW) -> gated skip (N, Co, HW)."""
    N, Cg, HW = g_ncm.shape
    _, Cs, _ = s_ncm.shape
    Co = wg.shape[0]
    assert wg.shape == (Co, Cg) and ws.shape == (Co, Cs) and wo.shape == (Co, Co)
    assert b_gs.shape == (Co, 1) and bo.shape == (Co, 1)
    # The gating multiply (att * s) requires Cs == Co, as in the PyTorch module.
    assert Cs == Co, f"skip channels ({Cs}) must equal out channels ({Co})"
    if out_dtype is None:
        out_dtype = s_ncm.dtype

    in_bytes = jnp.dtype(g_ncm.dtype).itemsize
    out_bytes = jnp.dtype(out_dtype).itemsize
    w_bytes = jnp.dtype(wg.dtype).itemsize

    # Per-lane-column bytes of the double-buffered streaming tiles (g, s, out).
    per_col = 2 * ((Cg + Cs) * in_bytes + Co * out_bytes)
    if hw_tile is None:
        hw_tile = _pick_hw_tile(HW, per_col)
    assert HW % hw_tile == 0, (HW, hw_tile)
    grid = (N, HW // hw_tile)

    # Explicit VMEM budget: streaming tiles + (double-buffered) weights/biases,
    # with headroom; capped well under v7x's 64 MiB physical VMEM.
    weight_bytes = (Cg * Co + Cs * Co + Co * Co) * w_bytes + 2 * Co * 4
    needed = per_col * hw_tile + 2 * weight_bytes
    vmem_limit = int(min(max(2 * needed, 32 << 20), 48 << 20))

    M = N * HW
    cost = pl.CostEstimate(
        flops=2 * M * (Cg * Co + Cs * Co + Co * Co) + 4 * M * Co,
        transcendentals=M * Co,
        bytes_accessed=M * ((Cg + Cs) * in_bytes + Co * out_bytes) + weight_bytes,
    )

    full = lambda shape: pl.BlockSpec(shape, lambda n, t: (0, 0))
    tile = lambda c: pl.BlockSpec((1, c, hw_tile), lambda n, t: (n, 0, t))

    return pl.pallas_call(
        _attention_gate_kernel,
        out_shape=jax.ShapeDtypeStruct((N, Co, HW), out_dtype),
        grid_spec=pltpu.PrefetchScalarGridSpec(
            num_scalar_prefetch=0,
            grid=grid,
            in_specs=[
                tile(Cg),            # g tile       (1, Cg, hw_tile)
                tile(Cs),            # s tile       (1, Cs, hw_tile)
                full((Co, Cg)),      # Wg weight (BN folded)
                full((Co, Cs)),      # Ws weight (BN folded)
                full((Co, 1)),       # folded bias (bg + bs), f32
                full((Co, Co)),      # output conv weight
                full((Co, 1)),       # output conv bias, f32
            ],
            out_specs=tile(Co),
        ),
        compiler_params=pltpu.CompilerParams(
            dimension_semantics=("parallel", "parallel"),
            vmem_limit_bytes=vmem_limit),
        cost_estimate=cost,
    )(g_ncm, s_ncm, wg, ws, b_gs, wo, bo)


# ----------------------------------------------------------------------------
# Parameter construction + NCHW wrapper (plain-JAX glue, no transposes).
# ----------------------------------------------------------------------------
def _fold_bn(conv_w, conv_b, gamma, beta, mean, var, eps=1e-5):
    """Fold eval-mode BatchNorm into a preceding 1x1 conv.

    conv_w: (Cout, Cin) (1x1 kernel squeezed), conv_b: (Cout,)
    returns (Cout, Cin) matmul weight and (Cout, 1) bias.
    """
    inv_std = gamma / jnp.sqrt(var + eps)
    w_eff = conv_w * inv_std[:, None]
    b_eff = (conv_b - mean) * inv_std + beta
    return w_eff, b_eff[:, None]


def init_attention_gate_params(key, in_c, out_c, param_dtype=jnp.float32):
    cg, cs = in_c
    ks = jax.random.split(key, 5)

    def conv_init(k, cout, cin):
        kw, kb = jax.random.split(k)
        bound = 1.0 / jnp.sqrt(cin)
        w = jax.random.uniform(kw, (cout, cin), jnp.float32, -bound, bound)
        b = jax.random.uniform(kb, (cout,), jnp.float32, -bound, bound)
        return w, b

    def bn_init(k, c):
        k1, k2, k3, k4 = jax.random.split(k, 4)
        return (jax.random.uniform(k1, (c,), jnp.float32, 0.5, 1.5),
                jax.random.uniform(k2, (c,), jnp.float32, -0.5, 0.5),
                jax.random.uniform(k3, (c,), jnp.float32, -0.5, 0.5),
                jax.random.uniform(k4, (c,), jnp.float32, 0.5, 1.5))

    wg_w, wg_b = conv_init(ks[0], out_c, cg)
    ws_w, ws_b = conv_init(ks[1], out_c, cs)
    wo_w, wo_b = conv_init(ks[2], out_c, out_c)
    wg_eff, bg_eff = _fold_bn(wg_w, wg_b, *bn_init(ks[3], out_c))
    ws_eff, bs_eff = _fold_bn(ws_w, ws_b, *bn_init(ks[4], out_c))
    return dict(
        wg=wg_eff.astype(param_dtype),
        ws=ws_eff.astype(param_dtype),
        b_gs=(bg_eff + bs_eff),          # two branch biases folded; kept f32
        wo=wo_w.astype(param_dtype),
        bo=wo_b[:, None],                # kept f32
    )


@functools.partial(jax.jit, static_argnames=("out_dtype", "hw_tile"))
def attention_gate(g_nchw, s_nchw, params, out_dtype=None, hw_tile=None):
    """NCHW in / NCHW out, matching the PyTorch module (no layout transposes)."""
    N, Cg, H, W = g_nchw.shape
    _, Cs, _, _ = s_nchw.shape
    g_ncm = g_nchw.reshape(N, Cg, H * W)   # free reshape: NCHW is channel-major
    s_ncm = s_nchw.reshape(N, Cs, H * W)
    out = attention_gate_pallas(
        g_ncm, s_ncm, params["wg"], params["ws"], params["b_gs"],
        params["wo"], params["bo"], out_dtype=out_dtype, hw_tile=hw_tile)
    return out.reshape(N, out.shape[1], H, W)


def attention_gate_reference(g_nchw, s_nchw, params):
    """Pure-JAX reference (same folded parameters), f32 math."""
    N, Cg, H, W = g_nchw.shape
    Cs = s_nchw.shape[1]
    g = g_nchw.reshape(N, Cg, H * W).astype(jnp.float32)
    s = s_nchw.reshape(N, Cs, H * W).astype(jnp.float32)
    wg = params["wg"].astype(jnp.float32)
    ws = params["ws"].astype(jnp.float32)
    wo = params["wo"].astype(jnp.float32)
    a = jnp.einsum("oc,ncm->nom", wg, g)
    b = jnp.einsum("oc,ncm->nom", ws, s)
    h = jnp.maximum(a + b + params["b_gs"][None], 0.0)
    att = jax.nn.sigmoid(jnp.einsum("oc,ncm->nom", wo, h) + params["bo"][None])
    out = att * s
    return out.reshape(N, -1, H, W)


if __name__ == "__main__":
    key = jax.random.PRNGKey(0)
    k_g, k_s, k_p = jax.random.split(key, 3)

    # Small shapes consistent with the module: in_c = (4, 4), out_c = 4.
    N, Cg, Cs, Co, H, W = 2, 4, 4, 4, 16, 16
    g = jax.random.normal(k_g, (N, Cg, H, W), jnp.float32)
    s = jax.random.normal(k_s, (N, Cs, H, W), jnp.float32)

    # f32 path: exact check against the pure-JAX reference.
    params = init_attention_gate_params(k_p, (Cg, Cs), Co)
    out = jax.block_until_ready(attention_gate(g, s, params))
    ref = attention_gate_reference(g, s, params)
    assert out.shape == (N, Co, H, W), out.shape
    assert jnp.allclose(out, ref, atol=1e-5, rtol=1e-5), "f32 mismatch vs ref"

    # bf16 streaming path (bf16 MXU inputs, f32 accumulate/elementwise,
    # bf16 output): halves HBM traffic on v6e/v7x. Loose-tolerance check.
    params_bf16 = init_attention_gate_params(k_p, (Cg, Cs), Co,
                                             param_dtype=jnp.bfloat16)
    out_bf16 = jax.block_until_ready(
        attention_gate(g.astype(jnp.bfloat16), s.astype(jnp.bfloat16),
                       params_bf16, out_dtype=jnp.bfloat16))
    ref_bf16 = attention_gate_reference(g, s, params_bf16)
    assert out_bf16.shape == (N, Co, H, W)
    assert jnp.allclose(out_bf16.astype(jnp.float32), ref_bf16,
                        atol=1e-1, rtol=1e-1), "bf16 mismatch vs ref"

    print("KERNEL_OK")
</pallas_src>

<mosaic_0001>
module attributes {stable_mosaic.version = 11 : i64} {
  func.func @_attention_gate_kernel(%arg0: i32, %arg1: i32, %arg2: memref<1x4x256xf32, #tpu.memory_space<vmem>>, %arg3: memref<1x4x256xf32, #tpu.memory_space<vmem>>, %arg4: memref<4x4xf32, #tpu.memory_space<vmem>>, %arg5: memref<4x4xf32, #tpu.memory_space<vmem>>, %arg6: memref<4x1xf32, #tpu.memory_space<vmem>>, %arg7: memref<4x4xf32, #tpu.memory_space<vmem>>, %arg8: memref<4x1xf32, #tpu.memory_space<vmem>>, %arg9: memref<1x4x256xf32, #tpu.memory_space<vmem>>) attributes {dimension_semantics = [#tpu.dimension_semantics<parallel>, #tpu.dimension_semantics<parallel>], iteration_bounds = array<i64: 2, 1>, scalar_prefetch = 0 : i64, scratch_operands = 0 : i64, tpu.core_type = #tpu.core_type<tc>, window_params = [{transform_indices = @transform_0, window_bounds = array<i64: 1, 4, 256>}, {transform_indices = @transform_1, window_bounds = array<i64: 1, 4, 256>}, {pipeline_mode = #tpu.pipeline_mode<synchronous>, transform_indices = @transform_2, window_bounds = array<i64: 4, 4>}, {pipeline_mode = #tpu.pipeline_mode<synchronous>, transform_indices = @transform_3, window_bounds = array<i64: 4, 4>}, {pipeline_mode = #tpu.pipeline_mode<synchronous>, transform_indices = @transform_4, window_bounds = array<i64: 4, 1>}, {pipeline_mode = #tpu.pipeline_mode<synchronous>, transform_indices = @transform_5, window_bounds = array<i64: 4, 4>}, {pipeline_mode = #tpu.pipeline_mode<synchronous>, transform_indices = @transform_6, window_bounds = array<i64: 4, 1>}, {transform_indices = @transform_7, window_bounds = array<i64: 1, 4, 256>}]} {
    %c0 = arith.constant 0 : index
    %c0_0 = arith.constant 0 : index
    %c0_1 = arith.constant 0 : index
    %0 = vector.load %arg2[%c0, %c0_0, %c0_1] : memref<1x4x256xf32, #tpu.memory_space<vmem>>, vector<1x4x256xf32>
    %1 = vector.shape_cast %0 : vector<1x4x256xf32> to vector<4x256xf32>
    %c0_2 = arith.constant 0 : index
    %c0_3 = arith.constant 0 : index
    %c0_4 = arith.constant 0 : index
    %2 = vector.load %arg3[%c0_2, %c0_3, %c0_4] : memref<1x4x256xf32, #tpu.memory_space<vmem>>, vector<1x4x256xf32>
    %3 = vector.shape_cast %2 : vector<1x4x256xf32> to vector<4x256xf32>
    %c0_5 = arith.constant 0 : index
    %c0_6 = arith.constant 0 : index
    %4 = vector.load %arg4[%c0_5, %c0_6] : memref<4x4xf32, #tpu.memory_space<vmem>>, vector<4x4xf32>
    %cst = arith.constant dense<0.000000e+00> : vector<4x256xf32>
    %5 = tpu.matmul %4, %1, %cst {dimension_numbers = #tpu.dot_dimension_numbers<[1], [0], [0], [1], [0, 0, 1, 1], [], []>} : vector<4x4xf32>, vector<4x256xf32>, vector<4x256xf32> -> vector<4x256xf32>
    %c0_7 = arith.constant 0 : index
    %c0_8 = arith.constant 0 : index
    %6 = vector.load %arg5[%c0_7, %c0_8] : memref<4x4xf32, #tpu.memory_space<vmem>>, vector<4x4xf32>
    %cst_9 = arith.constant dense<0.000000e+00> : vector<4x256xf32>
    %7 = tpu.matmul %6, %3, %cst_9 {dimension_numbers = #tpu.dot_dimension_numbers<[1], [0], [0], [1], [0, 0, 1, 1], [], []>} : vector<4x4xf32>, vector<4x256xf32>, vector<4x256xf32> -> vector<4x256xf32>
    %8 = arith.addf %5, %7 : vector<4x256xf32>
    %c0_10 = arith.constant 0 : index
    %c0_11 = arith.constant 0 : index
    %9 = vector.load %arg6[%c0_10, %c0_11] : memref<4x1xf32, #tpu.memory_space<vmem>>, vector<4x1xf32>
    %10 = vector.broadcast %9 : vector<4x1xf32> to vector<4x256xf32>
    %11 = arith.addf %8, %10 : vector<4x256xf32>
    %cst_12 = arith.constant 0.000000e+00 : f32
    %12 = vector.broadcast %cst_12 : f32 to vector<4x256xf32>
    %13 = arith.maximumf %11, %12 : vector<4x256xf32>
    %c0_13 = arith.constant 0 : index
    %c0_14 = arith.constant 0 : index
    %14 = vector.load %arg7[%c0_13, %c0_14] : memref<4x4xf32, #tpu.memory_space<vmem>>, vector<4x4xf32>
    %cst_15 = arith.constant dense<0.000000e+00> : vector<4x256xf32>
    %15 = tpu.matmul %14, %13, %cst_15 {dimension_numbers = #tpu.dot_dimension_numbers<[1], [0], [0], [1], [0, 0, 1, 1], [], []>} : vector<4x4xf32>, vector<4x256xf32>, vector<4x256xf32> -> vector<4x256xf32>
    %c0_16 = arith.constant 0 : index
    %c0_17 = arith.constant 0 : index
    %16 = vector.load %arg8[%c0_16, %c0_17] : memref<4x1xf32, #tpu.memory_space<vmem>>, vector<4x1xf32>
    %17 = vector.broadcast %16 : vector<4x1xf32> to vector<4x256xf32>
    %18 = arith.addf %15, %17 : vector<4x256xf32>
    %19 = arith.negf %18 : vector<4x256xf32>
    %20 = math.exp %19 : vector<4x256xf32>
    %cst_18 = arith.constant 1.000000e+00 : f32
    %21 = vector.broadcast %cst_18 : f32 to vector<4x256xf32>
    %22 = arith.addf %21, %20 : vector<4x256xf32>
    %23 = arith.divf %21, %22 : vector<4x256xf32>
    %24 = arith.mulf %23, %3 : vector<4x256xf32>
    %c0_19 = arith.constant 0 : index
    %c0_20 = arith.constant 0 : index
    %c0_21 = arith.constant 0 : index
    %25 = vector.load %arg9[%c0_19, %c0_20, %c0_21] : memref<1x4x256xf32, #tpu.memory_space<vmem>>, vector<1x4x256xf32>
    %26 = vector.shape_cast %25 : vector<1x4x256xf32> to vector<4x256xf32>
    %27 = vector.shape_cast %24 : vector<4x256xf32> to vector<1x4x256xf32>
    tpu.vector_store %arg9[%c0_19, %c0_20, %c0_21], %27 {strides = array<i32>} : memref<1x4x256xf32, #tpu.memory_space<vmem>>, vector<1x4x256xf32>,
    return
  }
  func.func @transform_0(%arg0: i32, %arg1: i32) -> (i32, i32, i32) {
    %c0_i32 = arith.constant 0 : i32
    %c0_i32_0 = arith.constant 0 : i32
    return %arg0, %c0_i32, %arg1 : i32, i32, i32
  }
  func.func @transform_1(%arg0: i32, %arg1: i32) -> (i32, i32, i32) {
    %c0_i32 = arith.constant 0 : i32
    %c0_i32_0 = arith.constant 0 : i32
    return %arg0, %c0_i32, %arg1 : i32, i32, i32
  }
  func.func @transform_2(%arg0: i32, %arg1: i32) -> (i32, i32) {
    %c0_i32 = arith.constant 0 : i32
    %c0_i32_0 = arith.constant 0 : i32
    %c0_i32_1 = arith.constant 0 : i32
    return %c0_i32, %c0_i32_0 : i32, i32
  }
  func.func @transform_3(%arg0: i32, %arg1: i32) -> (i32, i32) {
    %c0_i32 = arith.constant 0 : i32
    %c0_i32_0 = arith.constant 0 : i32
    %c0_i32_1 = arith.constant 0 : i32
    return %c0_i32, %c0_i32_0 : i32, i32
  }
  func.func @transform_4(%arg0: i32, %arg1: i32) -> (i32, i32) {
    %c0_i32 = arith.constant 0 : i32
    %c0_i32_0 = arith.constant 0 : i32
    %c0_i32_1 = arith.constant 0 : i32
    return %c0_i32, %c0_i32_0 : i32, i32
  }
  func.func @transform_5(%arg0: i32, %arg1: i32) -> (i32, i32) {
    %c0_i32 = arith.constant 0 : i32
    %c0_i32_0 = arith.constant 0 : i32
    %c0_i32_1 = arith.constant 0 : i32
    return %c0_i32, %c0_i32_0 : i32, i32
  }
  func.func @transform_6(%arg0: i32, %arg1: i32) -> (i32, i32) {
    %c0_i32 = arith.constant 0 : i32
    %c0_i32_0 = arith.constant 0 : i32
    %c0_i32_1 = arith.constant 0 : i32
    return %c0_i32, %c0_i32_0 : i32, i32
  }
  func.func @transform_7(%arg0: i32, %arg1: i32) -> (i32, i32, i32) {
    %c0_i32 = arith.constant 0 : i32
    %c0_i32_0 = arith.constant 0 : i32
    return %arg0, %c0_i32, %arg1 : i32, i32, i32
  }
}

</mosaic_0001>

<bundles_post_ra>
// kernel: attention_gate.1
= control target key start
LH: loop header
LB: loop body
LE: loop exit
PB: predicated region body
PF: predicated region fallthrough
CT: control target
= control target key end

     0   :  { %s874_s24 = smov 0   ;;  %s876_s25 = smov 0   ;;  %s939_s0 = inlined_call_operand.vmem [shape: f32[2,4,256], index: 0, kind: input, shape index: {}]   ;;  %s940_s1 = inlined_call_operand.vmem [shape: f32[2,4,256], index: 1, kind: input, shape index: {}]   ;;  %s941_s2 = inlined_call_operand.vmem [shape: f32[4,4], index: 2, kind: input, shape index: {}]   ;;  %s942_s3 = inlined_call_operand.vmem [shape: f32[4,4], index: 3, kind: input, shape index: {}]   ;;  %s943_s4 = inlined_call_operand.vmem [shape: f32[4,1], index: 4, kind: input, shape index: {}]   ;;  %s944_s5 = inlined_call_operand.vmem [shape: f32[4,4], index: 5, kind: input, shape index: {}]   ;;  %s945_s6 = inlined_call_operand.vmem [shape: f32[4,1], index: 6, kind: input, shape index: {}]   ;;  %s946_s7 = inlined_call_operand.vmem [shape: f32[2,4,256], index: 7, kind: output, shape index: {}]  }
   0x1   :  { %s878_s26 = smov 0  }
   0x2 LB: > { %s29_s27 = sadd.s32 1, %s826_s25  ;;  %p746_p0 = scmp.ge.s32.totalorder %s830_s26, 1  ;;  %s830_s26 = sphi %s878_s26, %s17_s26   ;;  %s826_s25 = sphi %s876_s25, %s948_s25   ;;  %s822_s24 = sphi %s874_s24, %s947_s24  }
   0x3   : > { %p31_p1 = scmp.ge.s32.totalorder %s29_s27, 2  ;;  %p275_p2 = scmp.lt.s32.totalorder %s830_s26, 3 }
   0x5   : > { %s950_s27 = smov (%p31_p1, %s29_s27), 0  ;;  %p276_p3 = pnand %p746_p0, %p275_p2 }
   0x6   : > { %p325_p4 = scmp.lt.s32.totalorder (!%p276_p3), %s822_s24, 1  ;;  %v832_v0 = vmov (!%p276_p3), 0.0   ;;  %v520_v1 = vld [vmem:[%s943_s4] sm:$0xf] (!%p276_p3)  ;;  %v833_v2 = vmov (!%p276_p3), 0   ;;  %vm364_vm0 = vcmask (!%p276_p3), 1043456  }
   0x7   : > { %279 = sbr.rel (%p276_p3) target bundleno = 495 (0x1ef), region = 48  ;;  %433 = vmatprep.mubr.f32.mxu0 (!%p276_p3), %v832_v0  ;;  %610 = vmatprep.mubr.f32.mxu1 (!%p276_p3), %v832_v0  ;;  %v531_v3 = vld [vmem:[%s945_s6] sm:$0xf] (!%p276_p3)  ;;  %vm360_vm1 = vcmask (!%p276_p3), 31744  }
   0x8   : > { %797 = vset.pattern.permute.xlu0 (!%p276_p3), %v833_v2  ;;  %v357_v8 = vld [vmem:[%s942_s3] sm:$0xf] (!%p276_p3) }
   0x9   : > { %523 = vperm.xlu0 (!%p276_p3), %797, %v520_v1   ;;  %v356_v9 = vld [vmem:[%s941_s2] sm:$0xf] (!%p276_p3) }
   0xa   : > { %v530_v17 = vld [vmem:[%s944_s5] sm:$0xf] (!%p276_p3) }
   0xd   : > { %534 = vperm.xlu0 (!%p276_p3), %797, %v531_v3  }
   0xe   : > { %s952_s24 = smov (!%p325_p4, %s822_s24), 1 }
   0xf   : > { %s895_s30 = sshll.u32 %s952_s24, 3 }
  0x10   : > { %s332_s12 = scalar_lea.vmem %s939_s0, %s895_s30  ;;  %s342_s15 = scalar_lea.vmem %s940_s1, %s895_s30 }
  0x11   : > { %v355_v4 = vld [vmem:[%s342_s15] sm:$0xff]  ;;  %s352_s24 = scalar_lea.vmem %s946_s7, %s895_s30 }
  0x12   : > { %v354_v5 = vld [vmem:[%s332_s12] sm:$0xff]  ;;  %v359_v6 = vcombine.high %v355_v4, %v355_v4 }
  0x13   : > { %v441_v7 = vcombine.high %v354_v5, %v354_v5 }
  0x14   : > { %753 = vmatprep.subr.msk.mxu0 %vm364_vm0, %v359_v6 }
  0x15   : > { %754 = vmatpush1.msk.msra.mxu0 %vm364_vm0, %v355_v4 }
  0x16   : > { %755 = vmatmul.mubr.msk.f32.vlgmr.msra.gmra.mrb[0].mxu0 %vm360_vm1, %v357_v8  ;;  %756 = vmatprep.subr.msk.mxu0 %vm364_vm0, %v441_v7 }
  0x17   : > { %757 = vmatpush1.msk.msra.mxu0 %vm364_vm0, %v354_v5  ;;  %513 = vmatprep.mubr.f32.mxu0 %v832_v0 }
  0x1e   : > { %758 = vmatmul.mubr.msk.f32.vlgmr.msra.gmra.mrb[0].mxu0 %vm360_vm1, %v356_v9 }
  0x88   : > { %v524_v10 = vpop.permute.xlu0 %523 }
  0x8c   : > { %v535_v18 = vpop.permute.xlu0 %534 }
  0xf1   : > { %v515_v11 = vpop.f32.mrb[0].mxu0 }
  0xf2   : > { %v526_v12 = vadd.f32 %v524_v10, %v515_v11  ;;  %v517_v13 = vpop.f32.mrb[1].mxu0 }
  0xf3   : > { %v527_v14 = vadd.f32 %v524_v10, %v517_v13 }
  0xf4   : > { %v528_v16 = vmax.f32 %v526_v12, 0.0 }
  0xf5   : > { %v529_v15 = vmax.f32 %v527_v14, 0.0 }
  0xf7   : > { %759 = vmatprep.subr.msk.mxu1 %vm364_vm0, %v529_v15 }
  0xf8   : > { %760 = vmatpush1.msk.msra.mxu1 %vm364_vm0, %v528_v16 }
  0xf9   : > { %761 = vmatmul.mubr.msk.f32.vlgmr.msra.gmra.mrb[0].mxu1 %vm360_vm1, %v530_v17 }
 0x1cc   : > { %v612_v19 = vpop.f32.mrb[0].mxu1 }
 0x1cd   : > { %v613_v20 = vadd.f32 %v612_v19, %v535_v18  ;;  %v614_v21 = vpop.f32.mrb[1].mxu1 }
 0x1ce   : > { %v615_v22 = vadd.f32 %v614_v21, %v535_v18 }
 0x1cf   : > { %v762_v23 = vmul.f32 -1.442695, %v613_v20 }
 0x1d0   : > { %v763_v24 = vmul.f32 -1.442695, %v615_v22 }
 0x1d1   : > { %800 = vpow2.f32 %v762_v23 }
 0x1d2   : > { %802 = vpow2.f32 %v763_v24 }
 0x1db   : > { %v801_v25 = vpop.eup %800 }
 0x1dc   : > { %v803_v26 = vpop.eup %802  ;;  %v623_v27 = vadd.f32 1.0, %v801_v25 }
 0x1dd   : > { %v624_v28 = vadd.f32 1.0, %v803_v26 }
 0x1de   : > { %804 = vrcp.f32 %v623_v27 }
 0x1df   : > { %806 = vrcp.f32 %v624_v28 }
 0x1e8   : > { %v805_v29 = vpop.eup %804 }
 0x1e9   : > { %v807_v30 = vpop.eup %806  ;;  %v630_v31 = vmul.f32 %v805_v29, %v355_v4 }
 0x1ea   : > { %v631_v32 = vmul.f32 %v807_v30, %v359_v6 }
 0x1ec   : > { %v634_v33 = vcombine.low %v630_v31, %v631_v32 }
 0x1ee   : > { %636 = vst [vmem:[%s352_s24] sm:$0xff] %v634_v33 }
 0x1ef PF: > { %s17_s26 = sadd.s32 1, %s830_s26   ;;  %s947_s24 = smov %s826_s25 }
 0x1f0   : > { %p14_p5 = scmp.ge.s32.totalorder %s17_s26, 4   ;;  %s948_s25 = smov %s950_s27 }
 0x1f2   :  { %16 = sbr.rel (!%p14_p5) target bundleno = 2 (0x2), region = 81 }

</bundles_post_ra>
